<compile_context>
chip_gen: v5e
topology: v5e:2x2
jax: 0.10.0
libtpu: 0.0.40
codegen_flags: <defaults>
</compile_context>

<pallas_src>
import functools

import jax
import jax.numpy as jnp
from jax import lax
from jax.experimental import pallas as pl
from jax.experimental.pallas import tpu as pltpu

_SUBLANES = 8
_LANES = 128
_MiB = 1024 * 1024
_CHUNK_BUDGET = 2 * _MiB   # max f32 row-chunk temporaries inside the kernel


def _largest_divisor_le(n, cap):
    """Largest divisor of n that is <= cap (at least 1)."""
    cap = max(1, min(n, cap))
    for d in range(cap, 0, -1):
        if n % d == 0:
            return d
    return 1


def _device_params():
    """(per-input per-buffer block budget, vmem_limit cap, tensorcores/device)."""
    try:
        kind = jax.devices()[0].device_kind.lower()
    except Exception:
        kind = ""
    if "v2" in kind or "v3" in kind:
        return 1 * _MiB, 14 * _MiB, 1          # small VMEM parts
    if "v5 lite" in kind or "v5lite" in kind or "v5e" in kind:
        return 4 * _MiB, 96 * _MiB, 1          # v5e: 128 MiB VMEM, 1 TC
    if "v6" in kind:
        return 6 * _MiB, 96 * _MiB, 1          # v6e: 128 MiB VMEM, 1 TC
    if "7" in kind:
        return 4 * _MiB, 48 * _MiB, 2          # v7x: 64 MiB VMEM, 2 TCs
    if "v4" in kind or "v5p" in kind or "v5" in kind:
        return 6 * _MiB, 96 * _MiB, 2          # v4 / v5p megacore: 2 TCs
    return 4 * _MiB, 48 * _MiB, 1              # unknown: conservative


def _nmse_split_kernel(xhat_ref, x_ref, power_ref, mse_ref, p_acc, m_acc, *, chunk):
    i_idx = pl.program_id(1)   # batch-block index (reduction axis)
    j_idx = pl.program_id(2)   # length-block index (reduction axis)

    @pl.when((i_idx == 0) & (j_idx == 0))
    def _init():
        p_acc[...] = jnp.zeros_like(p_acc)
        m_acc[...] = jnp.zeros_like(m_acc)

    tb = xhat_ref.shape[0]
    nchunks, rem = divmod(tb, chunk)

    def _accum(xh, xx):
        # Reduce over the leading batch axis only: pure VALU adds into vector
        # partials, no cross-lane traffic, bounded (chunk, C, tl) f32 temps.
        xh = xh.astype(jnp.float32)
        xx = xx.astype(jnp.float32)
        p_acc[...] += jnp.sum(xh * xh, axis=0)
        d = xx - xh
        m_acc[...] += jnp.sum(d * d, axis=0)

    if nchunks > 0:
        def _body(k, carry):
            off = k * chunk
            _accum(xhat_ref[pl.ds(off, chunk)], x_ref[pl.ds(off, chunk)])
            return carry
        lax.fori_loop(0, nchunks, _body, 0, unroll=(nchunks <= 4))

    if rem > 0:
        off = nchunks * chunk
        _accum(xhat_ref[pl.ds(off, rem)], x_ref[pl.ds(off, rem)])

    @pl.when((i_idx == pl.num_programs(1) - 1) & (j_idx == pl.num_programs(2) - 1))
    def _finalize():
        cf = p_acc.shape[0]
        # Single cross-lane (XLU) reduction per core, once at the very end.
        power = jnp.sum(p_acc[...], axis=1, keepdims=True)   # (Cf, 1)
        mse = jnp.sum(m_acc[...], axis=1, keepdims=True)     # (Cf, 1)
        power_ref[...] = power.reshape(1, cf, 1)
        mse_ref[...] = mse.reshape(1, cf, 1)


@jax.jit
def nmse_loss_split(x_hat, x):
    assert x_hat.shape == x.shape, "x_hat and x must have the same shape"
    assert x_hat.ndim == 3, "expected (batch, channels, length) inputs"
    B, C, L = x.shape
    out_dtype = jnp.result_type(x_hat.dtype, x.dtype)
    target_bytes, vmem_cap, ncores = _device_params()

    # --- (1) sublane fold: (B, C, L) -> (B/g, g*C, L) when C % 8 != 0 ---------
    g = 1
    if C % _SUBLANES != 0:
        for cand in range(2, _SUBLANES + 1):
            if B % cand == 0 and (cand * C) % _SUBLANES == 0:
                g = cand
                break
    Bf, Cf = B // g, g * C
    xh = x_hat.reshape(Bf, Cf, L) if g > 1 else x_hat
    xx = x.reshape(Bf, Cf, L) if g > 1 else x

    itemsize = max(x_hat.dtype.itemsize, x.dtype.itemsize)
    c_pad = -(-Cf // _SUBLANES) * _SUBLANES            # sublane-padded channel count
    row_f32 = c_pad * 4                                # f32 bytes per L element/row

    # --- (2) length tiling: C-aware cap, 128-multiples, pad only if needed ----
    if L * row_f32 <= target_bytes:
        tl, Lp = L, L                                  # whole L in one block
    else:
        cap_units = max(1, target_bytes // (row_f32 * _LANES))
        tl = None
        if L % _LANES == 0:
            d = _largest_divisor_le(L // _LANES, cap_units)
            if 2 * d >= cap_units:                     # good divisor -> no padding
                tl, Lp = d * _LANES, L
        if tl is None:
            tl = cap_units * _LANES
            Lp = -(-L // tl) * tl                      # zero-pad (exact: adds 0)
    nl = Lp // tl

    # --- (3) multi-TensorCore split: batch axis preferred, length as fallback -
    nsplit, split_len = 1, False
    if ncores >= 2:
        if Bf >= 2:
            nsplit = 2
        elif nl >= 2 and nl % 2 == 0:
            nsplit, split_len = 2, True
    b_work = Bf if split_len else -(-Bf // nsplit)
    nl_inner = nl // nsplit if split_len else nl

    # --- (4) batch tiling: good divisor if available, else exact zero-pad -----
    tb_cap = max(1, target_bytes // max(1, c_pad * tl * itemsize))
    tb = min(tb_cap, b_work)
    d = _largest_divisor_le(b_work, tb)
    if 2 * d >= tb:
        tb, b_work_pad = d, b_work
    else:
        b_work_pad = -(-b_work // tb) * tb
    nb = b_work_pad // tb
    B_pad = b_work_pad if split_len else b_work_pad * nsplit

    if (B_pad != Bf) or (Lp != L):
        pad = ((0, B_pad - Bf), (0, 0), (0, Lp - L))
        xh = jnp.pad(xh, pad)                          # zeros: exact for both sums
        xx = jnp.pad(xx, pad)

    grid = (nsplit, nb, nl_inner)
    if split_len:
        def in_map(p, i, j):
            return (i, 0, p * nl_inner + j)
    else:
        def in_map(p, i, j):
            return (p * nb + i, 0, j)

    # --- (5) in-kernel chunk size: bounded f32 temporaries, amortized loop ----
    row_f32_bytes = c_pad * tl * 4
    chunk = int(max(1, min(tb, _CHUNK_BUDGET // max(1, row_f32_bytes))))

    # --- (6) explicit VMEM budget: blocks + accumulators + temps + headroom ---
    in_bytes = 2 * tb * c_pad * tl * (x_hat.dtype.itemsize + x.dtype.itemsize)
    acc_bytes = 2 * row_f32_bytes
    temp_bytes = 3 * chunk * row_f32_bytes
    vmem_need = in_bytes + acc_bytes + temp_bytes + 512 * 1024
    vmem_limit = int(min(vmem_cap, max(32 * _MiB, int(vmem_need * 1.3))))

    n_elems = B * C * L
    power_parts, mse_parts = pl.pallas_call(
        functools.partial(_nmse_split_kernel, chunk=chunk),
        out_shape=(
            jax.ShapeDtypeStruct((nsplit, Cf, 1), jnp.float32),
            jax.ShapeDtypeStruct((nsplit, Cf, 1), jnp.float32),
        ),
        grid_spec=pltpu.PrefetchScalarGridSpec(
            num_scalar_prefetch=0,
            grid=grid,
            in_specs=[
                pl.BlockSpec((tb, Cf, tl), in_map),
                pl.BlockSpec((tb, Cf, tl), in_map),
            ],
            out_specs=[
                pl.BlockSpec((1, Cf, 1), lambda p, i, j: (p, 0, 0)),
                pl.BlockSpec((1, Cf, 1), lambda p, i, j: (p, 0, 0)),
            ],
            scratch_shapes=[
                pltpu.VMEM((Cf, tl), jnp.float32),   # per-channel power partials
                pltpu.VMEM((Cf, tl), jnp.float32),   # per-channel mse partials
            ],
        ),
        compiler_params=pltpu.CompilerParams(
            dimension_semantics=("parallel", "arbitrary", "arbitrary"),
            vmem_limit_bytes=vmem_limit,
        ),
        cost_estimate=pl.CostEstimate(
            flops=5 * n_elems,
            transcendentals=0,
            bytes_accessed=n_elems * (x_hat.dtype.itemsize + x.dtype.itemsize),
        ),
    )(xh, xx)

    # Un-fold the sublane fold and combine the per-core partials.
    power = power_parts.reshape(nsplit, g, C).sum(axis=(0, 1))   # (C,)
    mse = mse_parts.reshape(nsplit, g, C).sum(axis=(0, 1))       # (C,)
    return (mse / power).astype(out_dtype)


if __name__ == "__main__":
    key = jax.random.PRNGKey(0)
    k1, k2, k3, k4 = jax.random.split(key, 4)

    def _check(x_hat, x):
        out = jax.block_until_ready(nmse_loss_split(x_hat, x))
        xh32 = x_hat.astype(jnp.float32)
        x32 = x.astype(jnp.float32)
        ref_power = jnp.sum(xh32 ** 2, axis=(0, 2))
        ref_mse = jnp.sum((x32 - xh32) ** 2, axis=(0, 2))
        ref = ref_mse / ref_power
        assert out.shape == ref.shape, (out.shape, ref.shape)
        assert jnp.allclose(out, ref, rtol=1e-5, atol=1e-6), (out, ref)

    # Small (batch, channels, length) inputs consistent with the module.
    x = jax.random.normal(k1, (2, 4, 32), dtype=jnp.float32)
    x_hat = x + 0.1 * jax.random.normal(k2, (2, 4, 32), dtype=jnp.float32)
    _check(x_hat, x)

    # A second shape exercising batch tiling, the sublane fold and (where the
    # device has two TensorCores) the 2-way parallel split.
    x_b = jax.random.normal(k3, (8, 4, 256), dtype=jnp.float32)
    x_hat_b = x_b + 0.05 * jax.random.normal(k4, (8, 4, 256), dtype=jnp.float32)
    _check(x_hat_b, x_b)

    print("KERNEL_OK")
</pallas_src>

<mosaic_0001>
module attributes {stable_mosaic.version = 11 : i64} {
  func.func @_nmse_split_kernel(%arg0: i32, %arg1: i32, %arg2: i32, %arg3: memref<1x8x32xf32, #tpu.memory_space<vmem>>, %arg4: memref<1x8x32xf32, #tpu.memory_space<vmem>>, %arg5: memref<1x8x1xf32, #tpu.memory_space<vmem>>, %arg6: memref<1x8x1xf32, #tpu.memory_space<vmem>>, %arg7: memref<8x32xf32, #tpu.memory_space<vmem>>, %arg8: memref<8x32xf32, #tpu.memory_space<vmem>>) attributes {dimension_semantics = [#tpu.dimension_semantics<parallel>, #tpu.dimension_semantics<arbitrary>, #tpu.dimension_semantics<arbitrary>], iteration_bounds = array<i64: 1, 1, 1>, scalar_prefetch = 0 : i64, scratch_operands = 2 : i64, tpu.core_type = #tpu.core_type<tc>, window_params = [{transform_indices = @transform_0, window_bounds = array<i64: 1, 8, 32>}, {transform_indices = @transform_1, window_bounds = array<i64: 1, 8, 32>}, {transform_indices = @transform_2, window_bounds = array<i64: 1, 8, 1>}, {transform_indices = @transform_3, window_bounds = array<i64: 1, 8, 1>}]} {
    %c0_i32 = arith.constant 0 : i32
    %0 = arith.cmpi eq, %arg1, %c0_i32 : i32
    %c0_i32_0 = arith.constant 0 : i32
    %1 = arith.cmpi eq, %arg2, %c0_i32_0 : i32
    %2 = arith.andi %0, %1 : i1
    %3 = arith.extui %2 : i1 to i32
    %c0_i32_1 = arith.constant 0 : i32
    %4 = arith.cmpi ne, %3, %c0_i32_1 : i32
    scf.if %4 {
      %cst_19 = arith.constant 0.000000e+00 : f32
      %26 = vector.broadcast %cst_19 : f32 to vector<8x32xf32>
      %c0_20 = arith.constant 0 : index
      %c0_21 = arith.constant 0 : index
      %27 = vector.load %arg7[%c0_20, %c0_21] : memref<8x32xf32, #tpu.memory_space<vmem>>, vector<8x32xf32>
      tpu.vector_store %arg7[%c0_20, %c0_21], %26 {strides = array<i32>} : memref<8x32xf32, #tpu.memory_space<vmem>>, vector<8x32xf32>,
      %cst_22 = arith.constant 0.000000e+00 : f32
      %28 = vector.broadcast %cst_22 : f32 to vector<8x32xf32>
      %c0_23 = arith.constant 0 : index
      %c0_24 = arith.constant 0 : index
      %29 = vector.load %arg8[%c0_23, %c0_24] : memref<8x32xf32, #tpu.memory_space<vmem>>, vector<8x32xf32>
      tpu.vector_store %arg8[%c0_23, %c0_24], %28 {strides = array<i32>} : memref<8x32xf32, #tpu.memory_space<vmem>>, vector<8x32xf32>,
    } else {
    }
    %c0_i32_2 = arith.constant 0 : i32
    %c1_i32 = arith.constant 1 : i32
    %5 = arith.muli %c0_i32_2, %c1_i32 : i32
    %6 = arith.index_cast %5 : i32 to index
    %c0 = arith.constant 0 : index
    %c0_3 = arith.constant 0 : index
    %7 = vector.load %arg3[%6, %c0, %c0_3] : memref<1x8x32xf32, #tpu.memory_space<vmem>>, vector<1x8x32xf32>
    %8 = arith.index_cast %5 : i32 to index
    %c0_4 = arith.constant 0 : index
    %c0_5 = arith.constant 0 : index
    %9 = vector.load %arg4[%8, %c0_4, %c0_5] : memref<1x8x32xf32, #tpu.memory_space<vmem>>, vector<1x8x32xf32>
    %c0_6 = arith.constant 0 : index
    %c0_7 = arith.constant 0 : index
    %10 = vector.load %arg7[%c0_6, %c0_7] : memref<8x32xf32, #tpu.memory_space<vmem>>, vector<8x32xf32>
    %11 = arith.mulf %7, %7 : vector<1x8x32xf32>
    %cst = arith.constant dense<0.000000e+00> : vector<8x32xf32>
    %12 = vector.multi_reduction <add>, %11, %cst [0] : vector<1x8x32xf32> to vector<8x32xf32>
    %13 = arith.addf %10, %12 : vector<8x32xf32>
    %c0_8 = arith.constant 0 : index
    %c0_9 = arith.constant 0 : index
    %14 = vector.load %arg7[%c0_8, %c0_9] : memref<8x32xf32, #tpu.memory_space<vmem>>, vector<8x32xf32>
    tpu.vector_store %arg7[%c0_8, %c0_9], %13 {strides = array<i32>} : memref<8x32xf32, #tpu.memory_space<vmem>>, vector<8x32xf32>,
    %15 = arith.subf %9, %7 : vector<1x8x32xf32>
    %c0_10 = arith.constant 0 : index
    %c0_11 = arith.constant 0 : index
    %16 = vector.load %arg8[%c0_10, %c0_11] : memref<8x32xf32, #tpu.memory_space<vmem>>, vector<8x32xf32>
    %17 = arith.mulf %15, %15 : vector<1x8x32xf32>
    %cst_12 = arith.constant dense<0.000000e+00> : vector<8x32xf32>
    %18 = vector.multi_reduction <add>, %17, %cst_12 [0] : vector<1x8x32xf32> to vector<8x32xf32>
    %19 = arith.addf %16, %18 : vector<8x32xf32>
    %c0_13 = arith.constant 0 : index
    %c0_14 = arith.constant 0 : index
    %20 = vector.load %arg8[%c0_13, %c0_14] : memref<8x32xf32, #tpu.memory_space<vmem>>, vector<8x32xf32>
    tpu.vector_store %arg8[%c0_13, %c0_14], %19 {strides = array<i32>} : memref<8x32xf32, #tpu.memory_space<vmem>>, vector<8x32xf32>,
    %c1_i32_15 = arith.constant 1 : i32
    %c0_i32_16 = arith.constant 0 : i32
    %21 = arith.cmpi eq, %arg1, %c0_i32_16 : i32
    %c0_i32_17 = arith.constant 0 : i32
    %22 = arith.cmpi eq, %arg2, %c0_i32_17 : i32
    %23 = arith.andi %21, %22 : i1
    %24 = arith.extui %23 : i1 to i32
    %c0_i32_18 = arith.constant 0 : i32
    %25 = arith.cmpi ne, %24, %c0_i32_18 : i32
    scf.if %25 {
      %c0_19 = arith.constant 0 : index
      %c0_20 = arith.constant 0 : index
      %26 = vector.load %arg7[%c0_19, %c0_20] : memref<8x32xf32, #tpu.memory_space<vmem>>, vector<8x32xf32>
      %cst_21 = arith.constant dense<0.000000e+00> : vector<8xf32>
      %27 = vector.multi_reduction <add>, %26, %cst_21 [1] : vector<8x32xf32> to vector<8xf32>
      %28 = vector.shape_cast %27 : vector<8xf32> to vector<8x1xf32>
      %c0_22 = arith.constant 0 : index
      %c0_23 = arith.constant 0 : index
      %29 = vector.load %arg8[%c0_22, %c0_23] : memref<8x32xf32, #tpu.memory_space<vmem>>, vector<8x32xf32>
      %cst_24 = arith.constant dense<0.000000e+00> : vector<8xf32>
      %30 = vector.multi_reduction <add>, %29, %cst_24 [1] : vector<8x32xf32> to vector<8xf32>
      %31 = vector.shape_cast %30 : vector<8xf32> to vector<8x1xf32>
      %32 = vector.shape_cast %28 : vector<8x1xf32> to vector<1x8x1xf32>
      %c0_25 = arith.constant 0 : index
      %c0_26 = arith.constant 0 : index
      %c0_27 = arith.constant 0 : index
      %33 = vector.load %arg5[%c0_25, %c0_26, %c0_27] : memref<1x8x1xf32, #tpu.memory_space<vmem>>, vector<1x8x1xf32>
      tpu.vector_store %arg5[%c0_25, %c0_26, %c0_27], %32 {strides = array<i32>} : memref<1x8x1xf32, #tpu.memory_space<vmem>>, vector<1x8x1xf32>,
      %34 = vector.shape_cast %31 : vector<8x1xf32> to vector<1x8x1xf32>
      %c0_28 = arith.constant 0 : index
      %c0_29 = arith.constant 0 : index
      %c0_30 = arith.constant 0 : index
      %35 = vector.load %arg6[%c0_28, %c0_29, %c0_30] : memref<1x8x1xf32, #tpu.memory_space<vmem>>, vector<1x8x1xf32>
      tpu.vector_store %arg6[%c0_28, %c0_29, %c0_30], %34 {strides = array<i32>} : memref<1x8x1xf32, #tpu.memory_space<vmem>>, vector<1x8x1xf32>,
    } else {
    }
    return
  }
  func.func @transform_0(%arg0: i32, %arg1: i32, %arg2: i32) -> (i32, i32, i32) {
    %c1_i32 = arith.constant 1 : i32
    %0 = arith.muli %arg0, %c1_i32 : i32
    %1 = arith.addi %0, %arg1 : i32
    %c0_i32 = arith.constant 0 : i32
    %c0_i32_0 = arith.constant 0 : i32
    return %1, %c0_i32, %arg2 : i32, i32, i32
  }
  func.func @transform_1(%arg0: i32, %arg1: i32, %arg2: i32) -> (i32, i32, i32) {
    %c1_i32 = arith.constant 1 : i32
    %0 = arith.muli %arg0, %c1_i32 : i32
    %1 = arith.addi %0, %arg1 : i32
    %c0_i32 = arith.constant 0 : i32
    %c0_i32_0 = arith.constant 0 : i32
    return %1, %c0_i32, %arg2 : i32, i32, i32
  }
  func.func @transform_2(%arg0: i32, %arg1: i32, %arg2: i32) -> (i32, i32, i32) {
    %c0_i32 = arith.constant 0 : i32
    %c0_i32_0 = arith.constant 0 : i32
    %c0_i32_1 = arith.constant 0 : i32
    return %arg0, %c0_i32, %c0_i32_0 : i32, i32, i32
  }
  func.func @transform_3(%arg0: i32, %arg1: i32, %arg2: i32) -> (i32, i32, i32) {
    %c0_i32 = arith.constant 0 : i32
    %c0_i32_0 = arith.constant 0 : i32
    %c0_i32_1 = arith.constant 0 : i32
    return %arg0, %c0_i32, %c0_i32_0 : i32, i32, i32
  }
}

</mosaic_0001>

<bundles_post_ra>
// kernel: div.1
= control target key start
LH: loop header
LB: loop body
LE: loop exit
PB: predicated region body
PF: predicated region fallthrough
CT: control target
= control target key end

     0   :  { %3 = vsyncpa [#allocation1], 0  ;;  %s91_s0 = inlined_call_operand.vmem [shape: f32[4], index: 0, kind: input, shape index: {}]   ;;  %s92_s1 = inlined_call_operand.vmem [shape: f32[4], index: 1, kind: input, shape index: {}]   ;;  %s93_s2 = inlined_call_operand.hbm [shape: f32[4], index: 2, kind: output, shape index: {}]  }
   0x1   :  { %v5_v0 = vld [vmem:[%s92_s1] sm:$0x1]  ;;  %s30_s2 = sshll.u32 %s93_s2, 4  ;;  %s31_s2 = int_to_ptr.hbm [resolvable:$true] %s30_s2 }
   0x2   :  { %38 = vrcp.f32 %v5_v0  ;;  %v19_v3 = vand.u32 2147483648, %v5_v0  ;;  %vm13_vm0 = vweird.f32 %v5_v0  ;;  %v17_v5 = vand.u32 2147483647, %v5_v0  ;;  %v4_v9 = vld [vmem:[%s91_s0] sm:$0x1]  ;;  %s66_s0 = smov [#allocation0]  }
   0x3   :  { %s28_s12 = sshll.u32 %s66_s0, 4  ;;  %s29_s12 = int_to_ptr.vmem [resolvable:$true] %s28_s12 }
   0x4   :  { %v20_v7 = vor.u32 1.1754944e-38, %v19_v3  ;;  %vm18_vm3 = vcmp.eq.f32.partialorder %v17_v5, 8.507059e+37 }
   0x8   :  { %v39_v1 = vpop.eup %38 }
   0x9   :  { %v9_v2 = vmul.f32 %v39_v1, %v5_v0  ;;  %vm14_vm1 = vweird.f32 %v39_v1 }
   0xa   :  { %vm15_vm2 = vmor %vm13_vm0, %vm14_vm1 }
   0xb   :  { %v10_v4 = vsub.f32 1.0, %v9_v2 }
   0xd   :  { %v11_v6 = vmul.f32 %v39_v1, %v10_v4 }
   0xf   :  { %v12_v8 = vadd.f32 %v39_v1, %v11_v6 }
  0x11   :  { %v16_v10 = vsel %vm15_vm2, %v39_v1, %v12_v8 }
  0x12   :  { %v21_v11 = vsel %vm18_vm3, %v20_v7, %v16_v10 }
  0x13   :  { %v22_v12 = vmul.f32 %v21_v11, %v4_v9 }
  0x15   :  { %24 = vst [vmem:[#allocation0] sm:$0x1] %v22_v12 }
  0x16   :  { %33 = dma.vmem_to_hbm [thread:$0]  %s29_s12, 16, %s31_s2, [#allocation1]  }
  0x17   :  { %64 = dma.done.wait [#allocation1], 16  }
  0x18   :  { %65 = vsyncadd [#allocation1], 4294967280 }
  0x19   :  { %36 = vsyncpa [#allocation1], 1 }

// kernel: nmse_loss_split.1
= control target key start
LH: loop header
LB: loop body
LE: loop exit
PB: predicated region body
PF: predicated region fallthrough
CT: control target
= control target key end

     0   :  { %9 = vsyncpa [#allocation5], 0  ;;  %s191_s0 = inlined_call_operand.hbm [shape: f32[1,8,32], index: 0, kind: input, shape index: {}]   ;;  %s192_s1 = inlined_call_operand.hbm [shape: f32[1,8,32], index: 1, kind: input, shape index: {}]   ;;  %s193_s2 = inlined_call_operand.vmem [shape: f32[1,8,1], index: 2, kind: output, shape index: {0}]   ;;  %s194_s3 = inlined_call_operand.vmem [shape: f32[1,8,1], index: 3, kind: output, shape index: {1}]  }
   0x1   :  { %s19_s14 = sshll.u32 %s191_s0, 4  ;;  %s20_s14 = int_to_ptr.hbm [resolvable:$true] %s19_s14 }
   0x2   :  { %10 = vsyncpa [#allocation7], 0  ;;  %s150_s15 = smov [#allocation4]   ;;  %s33_s19 = sshll.u32 %s192_s1, 4  ;;  %s34_s19 = int_to_ptr.hbm [resolvable:$true] %s33_s19 }
   0x3   :  { %s21_s16 = sshll.u32 %s150_s15, 4  ;;  %s151_s20 = smov [#allocation6]   ;;  %s22_s16 = int_to_ptr.vmem [resolvable:$true] %s21_s16 }
   0x4   :  { %24 = dma.hbm_to_vmem [thread:$0]  %s20_s14, 128, %s22_s16, [#allocation5]  }
   0x5   :  { %s35_s21 = sshll.u32 %s151_s20, 4  ;;  %s36_s21 = int_to_ptr.vmem [resolvable:$true] %s35_s21 }
   0x6   :  { %38 = dma.hbm_to_vmem [thread:$0]  %s34_s19, 128, %s36_s21, [#allocation7]  }
   0x7   :  { %146 = dma.done.wait [#allocation5], 128  }
   0x8   :  { %147 = vsyncadd [#allocation5], 4294967168 }
   0x9   :  { %148 = dma.done.wait [#allocation7], 128  }
   0xa   :  { %149 = vsyncadd [#allocation7], 4294967168  ;;  %vm55_vm0 = vcmask 261120   ;;  %v152_v0 = vmov 0.0   ;;  %v58_v1 = vld [vmem:[#allocation4] sm:$0xff]  ;;  %v59_v2 = vld [vmem:[#allocation6] sm:$0xff] }
   0xb   :  { %56 = vst.msk [vmem:[#allocation2] sm:$0xff] %vm55_vm0, %v152_v0  ;;  %v61_v4 = vmul.f32 %v58_v1, %v58_v1  ;;  %v66_v5 = vsub.f32 %v59_v2, %v58_v1  ;;  %vm82_vm1 = vcmask 7168  }
   0xc   :  { %57 = vst.msk [vmem:[#allocation3] sm:$0xff] %vm55_vm0, %v152_v0 }
   0xd   :  { %v68_v8 = vmul.f32 %v66_v5, %v66_v5 }
  0x12   :  { %v60_v3 = vld [vmem:[#allocation2] sm:$0xff] }
  0x13   :  { %v67_v6 = vld [vmem:[#allocation3] sm:$0xff]  ;;  %v63_v7 = vadd.f32 %v61_v4, %v60_v3 }
  0x14   :  { %v70_v9 = vadd.f32 %v68_v8, %v67_v6 }
  0x15   :  { %65 = vst.msk [vmem:[#allocation2] sm:$0xff] %vm55_vm0, %v63_v7 }
  0x16   :  { %71 = vst.msk [vmem:[#allocation3] sm:$0xff] %vm55_vm0, %v70_v9 }
  0x1c   :  { %v74_v10 = vld [vmem:[#allocation2] sm:$0xff] }
  0x1d   :  { %v75_v11 = vsel %vm55_vm0, %v74_v10, 0.0  ;;  %v78_v12 = vld [vmem:[#allocation3] sm:$0xff] }
  0x1e   :  { %76 = vadd.xlane.f32.xlu0 %v75_v11  ;;  %v79_v13 = vsel %vm55_vm0, %v78_v12, 0.0 }
  0x26   :  { %80 = vadd.xlane.f32.xlu0 %v79_v13 }
  0x91   :  { %v77_v14 = vpop.xlane.xlu0 %76 }
  0x92   :  { %83 = vst.msk [vmem:[%s193_s2] sm:$0xff] %vm82_vm1, %v77_v14 }
  0x99   :  { %v81_v15 = vpop.xlane.xlu0 %80 }
  0x9a   :  { %84 = vst.msk [vmem:[%s194_s3] sm:$0xff] %vm82_vm1, %v81_v15 }
  0x9b   :  { %93 = vsyncpa [#allocation5], 1 }
  0x9c   :  { %94 = vsyncpa [#allocation7], 1 }

</bundles_post_ra>
